<compile_context>
chip_gen: v7x
topology: tpu7x:2x2x1
jax: 0.10.0
libtpu: 0.0.40
codegen_flags: <defaults>
</compile_context>

<pallas_src>
import math

import jax
import jax.numpy as jnp
from jax.experimental import pallas as pl
from jax.experimental.pallas import tpu as pltpu

_OUT_DIM = 7


def _round_up(v, m):
    return ((v + m - 1) // m) * m


def _vmem_budget_and_limit():
    """Chip-gated (tile budget, scoped vmem limit) in bytes."""
    try:
        cap = int(pltpu.get_tpu_info().vmem_capacity_bytes)
    except Exception:
        cap = 64 << 20  # conservative fallback (v7x per-core size)
    if cap >= (96 << 20):            # v5e / v6e: 128 MiB physical VMEM
        return 48 << 20, 80 << 20
    return 24 << 20, 32 << 20        # v7x: 64 MiB physical VMEM, leave headroom


def _choose_tb(B, D, budget):
    """Largest batch tile whose pipelined footprint fits the VMEM budget.

    Footprint ~= 2 double-buffered x tiles (TB*D f32) + 2 output tiles
    (lane-padded VMEM tiles: TB/8 * 4 KiB each) + resident (D, 7) weight
    (VMEM tile-padded: ceil(D/8)*4 KiB per buffer) + bias.
    """
    w_vmem = 2 * _round_up(D, 8) * 128 * 4      # resident weight, tile-padded, 2 bufs
    b_vmem = 2 * 8 * 128 * 4                    # bias
    per_row = 4 * 2 * D + 2 * 128 * 4           # x (2 bufs) + out (2 bufs, lane-padded)
    avail = max(budget - w_vmem - b_vmem, 8 * per_row)
    tb = avail // per_row
    tb = min(tb, 4096, _round_up(B, 8))
    tb = max(8, (tb // 8) * 8)
    return int(tb)


def _linear_kernel(x_ref, w_ref, b_ref, o_ref):
    # x_ref: (TB, D), w_ref: (D, 7) [pre-transposed], b_ref: (1, 7), o_ref: (TB, 7)
    y = jnp.dot(x_ref[...], w_ref[...], preferred_element_type=jnp.float32)
    o_ref[...] = (y + b_ref[...]).astype(o_ref.dtype)


def prepare_params(weight, bias):
    """One-time param prep (hoist out of the per-call path and cache the result).

    weight: (7, D) PyTorch layout -> (D, 7)
    bias:   (7,)                  -> (1, 7)
    """
    return weight.T, bias.reshape(1, -1)


def regresion_lineal_apply(x, w_t, b2):
    """Core Pallas forward. x: (B, D), w_t: (D, 7), b2: (1, 7) -> (B, 7)."""
    B, D = x.shape
    out_dim = w_t.shape[1]

    budget, vmem_limit = _vmem_budget_and_limit()
    TB = _choose_tb(B, D, budget)
    grid = (pl.cdiv(B, TB),)

    cost = pl.CostEstimate(
        flops=2 * B * D * out_dim,
        transcendentals=0,
        bytes_accessed=4 * (B * D + D * out_dim + B * out_dim + out_dim),
    )

    return pl.pallas_call(
        _linear_kernel,
        out_shape=jax.ShapeDtypeStruct((B, out_dim), x.dtype),
        grid_spec=pltpu.PrefetchScalarGridSpec(
            num_scalar_prefetch=0,
            grid=grid,
            in_specs=[
                # x streams over batch tiles (contiguous (TB, D) DMA)
                pl.BlockSpec((TB, D), lambda i: (i, 0)),
                # weight: constant block index -> DMA'd once, resident in VMEM
                pl.BlockSpec((D, out_dim), lambda i: (0, 0)),
                # bias: fully resident
                pl.BlockSpec((1, out_dim), lambda i: (0, 0)),
            ],
            out_specs=pl.BlockSpec((TB, out_dim), lambda i: (i, 0)),
        ),
        compiler_params=pltpu.CompilerParams(
            dimension_semantics=("parallel",),   # batch axis shards across TCs on v7x
            vmem_limit_bytes=vmem_limit,
        ),
        cost_estimate=cost,
    )(x, w_t, b2)


def regresion_lineal_forward(x, weight, bias):
    """Convenience wrapper matching PyTorch layout: x (B, D), weight (7, D), bias (7,)."""
    # TODO(synk): for repeated calls, call prepare_params once and reuse (w_t, b2).
    w_t, b2 = prepare_params(weight, bias)
    return regresion_lineal_apply(x, w_t, b2)


def init_params(key, input_dim, out_dim=_OUT_DIM):
    # Deterministic init mimicking PyTorch nn.Linear default:
    # U(-1/sqrt(in_features), 1/sqrt(in_features)) for both weight and bias.
    kw, kb = jax.random.split(key)
    bound = 1.0 / math.sqrt(input_dim)
    weight = jax.random.uniform(kw, (out_dim, input_dim), jnp.float32, -bound, bound)
    bias = jax.random.uniform(kb, (out_dim,), jnp.float32, -bound, bound)
    return weight, bias


if __name__ == "__main__":
    key = jax.random.PRNGKey(0)
    kx, kp = jax.random.split(key)

    # Small demo shape consistent with the module (at this size the kernel is pure
    # launch/DMA overhead — TB is auto-tuned against the real deployment shape).
    batch, input_dim = 8, 32
    x = jax.random.normal(kx, (batch, input_dim), jnp.float32)
    weight, bias = init_params(kp, input_dim)

    out = regresion_lineal_forward(x, weight, bias)
    out = jax.block_until_ready(out)

    # Reference check against plain JAX (same math as PyTorch x @ W.T + b).
    ref = x @ weight.T + bias
    assert out.shape == (batch, _OUT_DIM)
    assert jnp.allclose(out, ref, atol=1e-5, rtol=1e-5)

    print("KERNEL_OK")
</pallas_src>

<mosaic_0001>
module attributes {stable_mosaic.version = 11 : i64} {
  func.func @_linear_kernel(%arg0: i32, %arg1: memref<8x32xf32, #tpu.memory_space<vmem>>, %arg2: memref<32x7xf32, #tpu.memory_space<vmem>>, %arg3: memref<1x7xf32, #tpu.memory_space<vmem>>, %arg4: memref<8x7xf32, #tpu.memory_space<vmem>>) attributes {dimension_semantics = [#tpu.dimension_semantics<parallel>], iteration_bounds = array<i64: 1>, scalar_prefetch = 0 : i64, scratch_operands = 0 : i64, tpu.core_type = #tpu.core_type<tc>, window_params = [{transform_indices = @transform_0, window_bounds = array<i64: 8, 32>}, {pipeline_mode = #tpu.pipeline_mode<synchronous>, transform_indices = @transform_1, window_bounds = array<i64: 32, 7>}, {pipeline_mode = #tpu.pipeline_mode<synchronous>, transform_indices = @transform_2, window_bounds = array<i64: 1, 7>}, {transform_indices = @transform_3, window_bounds = array<i64: 8, 7>}]} {
    %c0 = arith.constant 0 : index
    %c0_0 = arith.constant 0 : index
    %0 = vector.load %arg1[%c0, %c0_0] : memref<8x32xf32, #tpu.memory_space<vmem>>, vector<8x32xf32>
    %c0_1 = arith.constant 0 : index
    %c0_2 = arith.constant 0 : index
    %1 = vector.load %arg2[%c0_1, %c0_2] : memref<32x7xf32, #tpu.memory_space<vmem>>, vector<32x7xf32>
    %cst = arith.constant dense<0.000000e+00> : vector<8x7xf32>
    %2 = tpu.matmul %0, %1, %cst {dimension_numbers = #tpu.dot_dimension_numbers<[1], [0], [0], [1], [0, 0, 1, 1], [], []>} : vector<8x32xf32>, vector<32x7xf32>, vector<8x7xf32> -> vector<8x7xf32>
    %c0_3 = arith.constant 0 : index
    %c0_4 = arith.constant 0 : index
    %3 = vector.load %arg3[%c0_3, %c0_4] : memref<1x7xf32, #tpu.memory_space<vmem>>, vector<1x7xf32>
    %4 = vector.broadcast %3 : vector<1x7xf32> to vector<8x7xf32>
    %5 = arith.addf %2, %4 : vector<8x7xf32>
    %c0_5 = arith.constant 0 : index
    %c0_6 = arith.constant 0 : index
    %6 = vector.load %arg4[%c0_5, %c0_6] : memref<8x7xf32, #tpu.memory_space<vmem>>, vector<8x7xf32>
    tpu.vector_store %arg4[%c0_5, %c0_6], %5 {strides = array<i32>} : memref<8x7xf32, #tpu.memory_space<vmem>>, vector<8x7xf32>,
    return
  }
  func.func @transform_0(%arg0: i32) -> (i32, i32) {
    %c0_i32 = arith.constant 0 : i32
    %c0_i32_0 = arith.constant 0 : i32
    return %arg0, %c0_i32 : i32, i32
  }
  func.func @transform_1(%arg0: i32) -> (i32, i32) {
    %c0_i32 = arith.constant 0 : i32
    %c0_i32_0 = arith.constant 0 : i32
    %c0_i32_1 = arith.constant 0 : i32
    return %c0_i32, %c0_i32_0 : i32, i32
  }
  func.func @transform_2(%arg0: i32) -> (i32, i32) {
    %c0_i32 = arith.constant 0 : i32
    %c0_i32_0 = arith.constant 0 : i32
    %c0_i32_1 = arith.constant 0 : i32
    return %c0_i32, %c0_i32_0 : i32, i32
  }
  func.func @transform_3(%arg0: i32) -> (i32, i32) {
    %c0_i32 = arith.constant 0 : i32
    %c0_i32_0 = arith.constant 0 : i32
    return %arg0, %c0_i32 : i32, i32
  }
}

</mosaic_0001>

<bundles_post_ra>
// kernel: tpu_custom_call.1
= control target key start
LH: loop header
LB: loop body
LE: loop exit
PB: predicated region body
PF: predicated region fallthrough
CT: control target
= control target key end

     0   :  { %v169_v3 = vmov 0.0|0.0   ;;  %vm170_vm0 = vmmov 0   ;;  %v171_v6 = vmov 0.0   ;;  %s223_s0 = inlined_call_operand.vmem [shape: f32[8,32], index: 0, kind: input, shape index: {}]   ;;  %s224_s1 = inlined_call_operand.vmem [shape: f32[32,7], index: 1, kind: input, shape index: {}]   ;;  %s225_s2 = inlined_call_operand.vmem [shape: f32[1,7], index: 2, kind: input, shape index: {}]   ;;  %s226_s3 = inlined_call_operand.hbm [shape: f32[8,7], index: 3, kind: output, shape index: {}]  }
   0x1   :  { %v16_v0 = vld [vmem:[%s224_s1] sm:$0xff]  ;;  %v17_v1 = vld [vmem:[%s224_s1 + $0x8] sm:$0xff]  ;;  %v18_v2 = vld [vmem:[%s224_s1 + $0x10] sm:$0xff]  ;;  %135 = vmatprep.subr.bf16.mxu0 %v169_v3  ;;  %132 = vmatprep.mubr.msk.f32.mxu0 %vm170_vm0, %v171_v6 }
   0x2   :  { %v136_v4 = vpack.c.bf16 %v17_v1, %v16_v0  ;;  %v19_v5 = vld [vmem:[%s224_s1 + $0x18] sm:$0xff] }
   0x3   :  { %8 = vsyncpa [#allocation3], 0  ;;  %v139_v7 = vpack.c.bf16 %v19_v5, %v18_v2  ;;  %v15_v8 = vld [vmem:[%s223_s0] sm:$0xff]  ;;  %vm27_vm1 = vcmask 261120   ;;  %s172_s24 = smov [#allocation2]   ;;  %vm101_vm2 = vcmask 56320  }
   0x4   :  { %137 = vmatpush3.bf16.msra.mxu0 %v136_v4  ;;  %v117_v9 = vld [vmem:[%s225_s2] ss:$0 sm:$0xff]  ;;  %s109_s1 = sshll.u32 %s172_s24, 4  ;;  %s110_s1 = int_to_ptr.vmem [resolvable:$true] %s109_s1 }
   0x5   :  { %138 = vmatprep.subr.bf16.mxu0 %v169_v3  ;;  %s145_s25 = scalar_lea.vmem %s110_s1, 128  ;;  %p150_p1 = scmp.lt.s32.totalorder %s110_s1, %s110_s1 }
   0x6   :  { %p146_p0 = scmp.ne.s32.totalorder %s110_s1, %s145_s25  ;;  %p151_p2 = scmp.lt.s32.totalorder %s145_s25, %s145_s25 }
   0x8   :  { %140 = vmatpush3.bf16.msra.mxu0 %v139_v7  ;;  %p152_p3 = por %p151_p2, %p150_p1 }
   0xa   :  { %p153_p4 = pnand %p152_p3, %p146_p0 }
   0xb   :  { %133 = vmatmul.mubr.msk.f32.vlgmr.msra.gmra.mrb[0].mxu0 %vm27_vm1, %v15_v8 }
  0xde   :  { %v97_v10 = vpop.f32.mrb[0].mxu0 }
  0xdf   :  { %v98_v11 = vadd.f32 %v117_v9, %v97_v10  ;;  %v134_v12 = vpop.f32.mrb[1].mxu0 }
  0xe1   :  { %102 = vst.msk [vmem:[#allocation2] sm:$0xff] %vm101_vm2, %v98_v11 }
  0xe2   :  { %156 = shalt.err (!%p153_p4)
}
  0xe3   :  { %s157_s27 = scalar_lea.hbm %s226_s3, 128 }
  0xe4   :  { %p158_p5 = scmp.ne.s32.totalorder %s226_s3, %s157_s27  ;;  %p161_p6 = scmp.lt.u32.totalorder %s157_s27, %s226_s3 }
  0xe6   :  { %p163_p7 = pnand %p161_p6, %p158_p5 }
  0xe8   :  { %166 = shalt.err (!%p163_p7)
}
  0xe9   :  { %112 = dma.vmem_to_hbm [thread:$0]  %s110_s1, 128, %s226_s3, [#allocation3]  }
  0xea   :  { %167 = dma.done.wait [#allocation3], 128  }
  0xeb   :  { %168 = vsyncadd [#allocation3], 4294967168 }
  0xec   :  { %116 = vsyncpa [#allocation3], 1 }

</bundles_post_ra>
